<compile_context>
chip_gen: v5e
topology: v5e:2x2
jax: 0.10.0
libtpu: 0.0.40
codegen_flags: <defaults>
</compile_context>

<pallas_src>
import jax
import jax.numpy as jnp
import numpy as np
from jax import lax
from jax.experimental import pallas as pl
from jax.experimental.pallas import tpu as pltpu

EPS = 1e-5


def conv_stats_kernel(xcol_ref, w_ref, y_ref, sum_ref, ssq_ref):
    """Pass 1: packed-contraction conv matmul + per-tile BN partial stats.

    xcol_ref: [1, KCp, rt]    bf16  (taps*Cin packed on the contraction axis)
    w_ref:    [Cout, KCp]     bf16
    y_ref:    [1, Cout, rt]   f32   (channel-major conv output)
    sum_ref:  [1, 1, Cout, 1] f32
    ssq_ref:  [1, 1, Cout, 1] f32
    """
    acc = jnp.dot(w_ref[...], xcol_ref[0], preferred_element_type=jnp.float32)
    y_ref[0] = acc
    sum_ref[0, 0] = jnp.sum(acc, axis=1, keepdims=True)
    ssq_ref[0, 0] = jnp.sum(acc * acc, axis=1, keepdims=True)


def bn_relu_kernel(y_ref, scale_ref, shift_ref, o_ref):
    """Pass 2: fused per-channel FMA (BN) + ReLU on channel-major, lane-dense tiles."""
    o_ref[0] = jnp.maximum(y_ref[0] * scale_ref[...] + shift_ref[...], 0.0)


def _pick_row_tile(rows_p, n_batch, bytes_per_row, max_block_bytes=2 << 20,
                   target_steps=8):
    """Largest 128-multiple divisor of rows_p fitting the byte budget while keeping
    >= target_steps total grid steps (v7x megacore / double buffering)."""
    cands = [t for t in range(128, rows_p + 1, 128) if rows_p % t == 0]
    if not cands:
        return rows_p
    fitting = [t for t in cands if t * bytes_per_row <= max_block_bytes] or [cands[0]]
    good = [t for t in fitting if n_batch * (rows_p // t) >= target_steps]
    return max(good) if good else min(fitting)


def conv_block_forward(x_ncdhw, w_khwio, bias, gamma, beta):
    """x: [N, Cin, D, H, W]; w: [kD, kH, kW, Cin, Cout]; returns [N, Cout, D, H, W]."""
    del bias  # cancels exactly under training-mode BatchNorm (mean subtracts it out)

    n, cin, d, h, w = x_ncdhw.shape
    kd, kh, kw, cin_w, cout = w_khwio.shape
    assert cin_w == cin
    assert kd % 2 == 1 and kh % 2 == 1 and kw % 2 == 1, "odd kernels only ('same' pad)"
    pd, ph, pw = kd // 2, kh // 2, kw // 2

    kc = kd * kh * kw * cin                      # packed contraction depth
    kc_p = -(-kc // 8) * 8                       # sublane-align the contraction axis
    rows = d * h * w                             # per-sample output rows
    rows_p = -(-rows // 128) * 128               # lane-align the row axis

    # --- layout plumbing (XLA glue): 3-D im2col, taps+Cin packed on one axis ---------
    xf = x_ncdhw.astype(jnp.float32)
    x_pad = jnp.pad(xf, ((0, 0), (0, 0), (pd, pd), (ph, ph), (pw, pw)))
    patches = [x_pad[:, :, i:i + d, j:j + h, k:k + w]
               for i in range(kd) for j in range(kh) for k in range(kw)]
    x_col = jnp.concatenate(patches, axis=1).reshape(n, kc, rows)
    # Zero padding: padded contraction columns multiply zero weights; padded rows
    # contribute 0 to both sum and sum-of-squares -> BN stats stay exact.
    x_col = jnp.pad(x_col, ((0, 0), (0, kc_p - kc), (0, rows_p - rows)))
    x_col = x_col.astype(jnp.bfloat16)

    # weight: [kD,kH,kW,Cin,Cout] -> [Cout, KC] matching the (tap, cin) packing above
    w_t = jnp.transpose(w_khwio.astype(jnp.float32), (4, 0, 1, 2, 3)).reshape(cout, kc)
    w_t = jnp.pad(w_t, ((0, 0), (0, kc_p - kc))).astype(jnp.bfloat16)

    # row tile: dominant per-step bytes = bf16 x_col block + f32 y block (per row)
    rt = _pick_row_tile(rows_p, n, kc_p * 2 + cout * 4)
    nb = rows_p // rt

    # --- pass 1: conv (packed contraction) + per-tile BN partial stats ---------------
    y, psum, pssq = pl.pallas_call(
        conv_stats_kernel,
        grid=(n, nb),
        in_specs=[
            pl.BlockSpec((1, kc_p, rt), lambda ni, bi: (ni, 0, bi)),
            pl.BlockSpec((cout, kc_p), lambda ni, bi: (0, 0)),
        ],
        out_specs=[
            pl.BlockSpec((1, cout, rt), lambda ni, bi: (ni, 0, bi)),
            pl.BlockSpec((1, 1, cout, 1), lambda ni, bi: (ni, bi, 0, 0)),
            pl.BlockSpec((1, 1, cout, 1), lambda ni, bi: (ni, bi, 0, 0)),
        ],
        out_shape=(
            jax.ShapeDtypeStruct((n, cout, rows_p), jnp.float32),
            jax.ShapeDtypeStruct((n, nb, cout, 1), jnp.float32),
            jax.ShapeDtypeStruct((n, nb, cout, 1), jnp.float32),
        ),
        compiler_params=pltpu.CompilerParams(
            dimension_semantics=("parallel", "parallel")),
    )(x_col, w_t)

    # --- tiny finalize: fold stats into a per-channel scale/shift FMA ----------------
    r_total = n * rows                                        # real rows only
    sums = jnp.sum(psum, axis=(0, 1))                         # [Cout, 1]
    sumsqs = jnp.sum(pssq, axis=(0, 1))                       # [Cout, 1]
    mean = sums / r_total
    var = jnp.maximum(sumsqs / r_total - mean * mean, 0.0)    # biased var (train BN)
    scale = gamma.reshape(cout, 1) * lax.rsqrt(var + EPS)
    shift = beta.reshape(cout, 1) - scale * mean

    # --- pass 2: normalize + ReLU; output is already channel-major / unpadded --------
    out_cm = pl.pallas_call(
        bn_relu_kernel,
        grid=(n, nb),
        in_specs=[
            pl.BlockSpec((1, cout, rt), lambda ni, bi: (ni, 0, bi)),
            pl.BlockSpec((cout, 1), lambda ni, bi: (0, 0)),
            pl.BlockSpec((cout, 1), lambda ni, bi: (0, 0)),
        ],
        out_specs=pl.BlockSpec((1, cout, rt), lambda ni, bi: (ni, 0, bi)),
        out_shape=jax.ShapeDtypeStruct((n, cout, rows_p), jnp.float32),
        compiler_params=pltpu.CompilerParams(
            dimension_semantics=("parallel", "parallel")),
    )(y, scale, shift)

    if rows_p != rows:
        out_cm = out_cm[:, :, :rows]
    return out_cm.reshape(n, cout, d, h, w)                   # NCDHW via free reshape


def reference_forward(x_ncdhw, w_khwio, bias, gamma, beta):
    """Pure-JAX reference (lax conv + bias + batch-stat BN + ReLU), f32 throughout."""
    w_oidhw = jnp.transpose(w_khwio, (4, 3, 0, 1, 2)).astype(jnp.float32)
    y = jax.lax.conv_general_dilated(
        x_ncdhw.astype(jnp.float32), w_oidhw,
        window_strides=(1, 1, 1), padding="SAME",
        dimension_numbers=("NCDHW", "OIDHW", "NCDHW"),
        precision=jax.lax.Precision.HIGHEST)
    y = y + bias.reshape(1, -1, 1, 1, 1)
    mean = jnp.mean(y, axis=(0, 2, 3, 4), keepdims=True)
    var = jnp.mean((y - mean) ** 2, axis=(0, 2, 3, 4), keepdims=True)
    y_hat = (y - mean) * jax.lax.rsqrt(var + EPS)
    z = gamma.reshape(1, -1, 1, 1, 1) * y_hat + beta.reshape(1, -1, 1, 1, 1)
    return jnp.maximum(z, 0.0)


if __name__ == "__main__":
    key = jax.random.PRNGKey(0)
    k_x, k_w, k_b = jax.random.split(key, 3)

    # Shapes consistent with Conv_block(in_channels=4, out_channels=8, kernels=3)
    N, Cin, Cout, D, H, W, K = 2, 4, 8, 16, 16, 16, 3
    x = jax.random.normal(k_x, (N, Cin, D, H, W), dtype=jnp.float32)

    fan_in = Cin * K * K * K
    bound = 1.0 / np.sqrt(fan_in)
    w = jax.random.uniform(k_w, (K, K, K, Cin, Cout), jnp.float32, -bound, bound)
    b = jax.random.uniform(k_b, (Cout,), jnp.float32, -bound, bound)
    gamma = jnp.ones((Cout,), jnp.float32)   # BatchNorm3d default affine init
    beta = jnp.zeros((Cout,), jnp.float32)

    # Quantize MXU operands to bf16 once and feed the same values to both paths:
    # bf16 x bf16 products accumulate exactly in f32, so the comparison stays tight.
    x_q = x.astype(jnp.bfloat16).astype(jnp.float32)
    w_q = w.astype(jnp.bfloat16).astype(jnp.float32)

    out = jax.block_until_ready(conv_block_forward(x_q, w_q, b, gamma, beta))
    ref = jax.block_until_ready(reference_forward(x_q, w_q, b, gamma, beta))

    assert out.shape == (N, Cout, D, H, W)
    np.testing.assert_allclose(np.asarray(out), np.asarray(ref),
                               rtol=1e-3, atol=1e-3)
    print("KERNEL_OK")
</pallas_src>

<mosaic_0001>
module attributes {stable_mosaic.version = 11 : i64} {
  func.func @conv_stats_kernel(%arg0: i32, %arg1: i32, %arg2: memref<1x112x1024xbf16, #tpu.memory_space<vmem>>, %arg3: memref<8x112xbf16, #tpu.memory_space<vmem>>, %arg4: memref<1x8x1024xf32, #tpu.memory_space<vmem>>, %arg5: memref<1x1x8x1xf32, #tpu.memory_space<vmem>>, %arg6: memref<1x1x8x1xf32, #tpu.memory_space<vmem>>) attributes {dimension_semantics = [#tpu.dimension_semantics<parallel>, #tpu.dimension_semantics<parallel>], iteration_bounds = array<i64: 2, 4>, scalar_prefetch = 0 : i64, scratch_operands = 0 : i64, tpu.core_type = #tpu.core_type<tc>, window_params = [{transform_indices = @transform_0, window_bounds = array<i64: 1, 112, 1024>}, {pipeline_mode = #tpu.pipeline_mode<synchronous>, transform_indices = @transform_1, window_bounds = array<i64: 8, 112>}, {transform_indices = @transform_2, window_bounds = array<i64: 1, 8, 1024>}, {transform_indices = @transform_3, window_bounds = array<i64: 1, 1, 8, 1>}, {transform_indices = @transform_4, window_bounds = array<i64: 1, 1, 8, 1>}]} {
    %c0 = arith.constant 0 : index
    %c0_0 = arith.constant 0 : index
    %0 = vector.load %arg3[%c0, %c0_0] : memref<8x112xbf16, #tpu.memory_space<vmem>>, vector<8x112xbf16>
    %c0_1 = arith.constant 0 : index
    %c0_2 = arith.constant 0 : index
    %c0_3 = arith.constant 0 : index
    %1 = vector.load %arg2[%c0_1, %c0_2, %c0_3] : memref<1x112x1024xbf16, #tpu.memory_space<vmem>>, vector<1x112x1024xbf16>
    %2 = vector.shape_cast %1 : vector<1x112x1024xbf16> to vector<112x1024xbf16>
    %cst = arith.constant dense<0.000000e+00> : vector<8x1024xf32>
    %3 = tpu.matmul %0, %2, %cst {dimension_numbers = #tpu.dot_dimension_numbers<[1], [0], [0], [1], [0, 0, 1, 1], [], []>} : vector<8x112xbf16>, vector<112x1024xbf16>, vector<8x1024xf32> -> vector<8x1024xf32>
    %c0_4 = arith.constant 0 : index
    %c0_5 = arith.constant 0 : index
    %c0_6 = arith.constant 0 : index
    %4 = vector.load %arg4[%c0_4, %c0_5, %c0_6] : memref<1x8x1024xf32, #tpu.memory_space<vmem>>, vector<1x8x1024xf32>
    %5 = vector.shape_cast %4 : vector<1x8x1024xf32> to vector<8x1024xf32>
    %6 = vector.shape_cast %3 : vector<8x1024xf32> to vector<1x8x1024xf32>
    tpu.vector_store %arg4[%c0_4, %c0_5, %c0_6], %6 {strides = array<i32>} : memref<1x8x1024xf32, #tpu.memory_space<vmem>>, vector<1x8x1024xf32>,
    %cst_7 = arith.constant dense<0.000000e+00> : vector<8xf32>
    %7 = vector.multi_reduction <add>, %3, %cst_7 [1] : vector<8x1024xf32> to vector<8xf32>
    %8 = vector.shape_cast %7 : vector<8xf32> to vector<8x1xf32>
    %c0_8 = arith.constant 0 : index
    %c0_9 = arith.constant 0 : index
    %c0_10 = arith.constant 0 : index
    %c0_11 = arith.constant 0 : index
    %9 = vector.load %arg5[%c0_8, %c0_9, %c0_10, %c0_11] : memref<1x1x8x1xf32, #tpu.memory_space<vmem>>, vector<1x1x8x1xf32>
    %10 = vector.shape_cast %9 : vector<1x1x8x1xf32> to vector<8x1xf32>
    %11 = vector.shape_cast %8 : vector<8x1xf32> to vector<1x1x8x1xf32>
    tpu.vector_store %arg5[%c0_8, %c0_9, %c0_10, %c0_11], %11 {strides = array<i32>} : memref<1x1x8x1xf32, #tpu.memory_space<vmem>>, vector<1x1x8x1xf32>,
    %12 = arith.mulf %3, %3 : vector<8x1024xf32>
    %cst_12 = arith.constant dense<0.000000e+00> : vector<8xf32>
    %13 = vector.multi_reduction <add>, %12, %cst_12 [1] : vector<8x1024xf32> to vector<8xf32>
    %14 = vector.shape_cast %13 : vector<8xf32> to vector<8x1xf32>
    %c0_13 = arith.constant 0 : index
    %c0_14 = arith.constant 0 : index
    %c0_15 = arith.constant 0 : index
    %c0_16 = arith.constant 0 : index
    %15 = vector.load %arg6[%c0_13, %c0_14, %c0_15, %c0_16] : memref<1x1x8x1xf32, #tpu.memory_space<vmem>>, vector<1x1x8x1xf32>
    %16 = vector.shape_cast %15 : vector<1x1x8x1xf32> to vector<8x1xf32>
    %17 = vector.shape_cast %14 : vector<8x1xf32> to vector<1x1x8x1xf32>
    tpu.vector_store %arg6[%c0_13, %c0_14, %c0_15, %c0_16], %17 {strides = array<i32>} : memref<1x1x8x1xf32, #tpu.memory_space<vmem>>, vector<1x1x8x1xf32>,
    return
  }
  func.func @transform_0(%arg0: i32, %arg1: i32) -> (i32, i32, i32) {
    %c0_i32 = arith.constant 0 : i32
    %c0_i32_0 = arith.constant 0 : i32
    return %arg0, %c0_i32, %arg1 : i32, i32, i32
  }
  func.func @transform_1(%arg0: i32, %arg1: i32) -> (i32, i32) {
    %c0_i32 = arith.constant 0 : i32
    %c0_i32_0 = arith.constant 0 : i32
    %c0_i32_1 = arith.constant 0 : i32
    return %c0_i32, %c0_i32_0 : i32, i32
  }
  func.func @transform_2(%arg0: i32, %arg1: i32) -> (i32, i32, i32) {
    %c0_i32 = arith.constant 0 : i32
    %c0_i32_0 = arith.constant 0 : i32
    return %arg0, %c0_i32, %arg1 : i32, i32, i32
  }
  func.func @transform_3(%arg0: i32, %arg1: i32) -> (i32, i32, i32, i32) {
    %c0_i32 = arith.constant 0 : i32
    %c0_i32_0 = arith.constant 0 : i32
    %c0_i32_1 = arith.constant 0 : i32
    return %arg0, %arg1, %c0_i32, %c0_i32_0 : i32, i32, i32, i32
  }
  func.func @transform_4(%arg0: i32, %arg1: i32) -> (i32, i32, i32, i32) {
    %c0_i32 = arith.constant 0 : i32
    %c0_i32_0 = arith.constant 0 : i32
    %c0_i32_1 = arith.constant 0 : i32
    return %arg0, %arg1, %c0_i32, %c0_i32_0 : i32, i32, i32, i32
  }
}

</mosaic_0001>

<bundles_post_ra>
// kernel: tpu_custom_call.1
= control target key start
LH: loop header
LB: loop body
LE: loop exit
PB: predicated region body
PF: predicated region fallthrough
CT: control target
= control target key end

     0   :  { %s1910_s0 = inlined_call_operand.hbm [shape: bf16[2,112,4096], index: 0, kind: input, shape index: {}]   ;;  %s1911_s1 = inlined_call_operand.hbm [shape: bf16[8,112], index: 1, kind: input, shape index: {}]   ;;  %s1912_s2 = inlined_call_operand.hbm [shape: f32[2,8,4096], index: 2, kind: output, shape index: {0}]   ;;  %s1913_s3 = inlined_call_operand.vmem [shape: f32[2,4,8,1], index: 3, kind: output, shape index: {1}]   ;;  %s1914_s4 = inlined_call_operand.vmem [shape: f32[2,4,8,1], index: 4, kind: output, shape index: {2}]  }
   0x1   :  { %1923 = sst [smem:[#allocation17_spill]] %s1911_s1 }
   0x2   :  { %1924 = sst [smem:[#allocation18_spill]] %s1913_s3 }
   0x3   :  { %1925 = sst [smem:[#allocation19_spill]] %s1914_s4 }
   0x4   :  { %10 = vsyncpa [#allocation3], 0 }
   0x5   :  { %12 = vsyncpa [#allocation3 + $0x1], 0 }
   0x6   :  { %13 = vsyncpa [#allocation6], 0 }
   0x7   :  { %14 = vsyncpa [#allocation4], 0 }
   0x8   :  { %16 = vsyncpa [#allocation4 + $0x1], 0  ;;  %s1583_s15 = smov 0   ;;  %s1585_s16 = smov 0  }
   0x9   :  { %s1587_s17 = smov 0   ;;  %s1589_s18 = smov 0  }
   0xa   :  { %s1591_s19 = smov 0   ;;  %s1593_s20 = smov 0  }
   0xb   :  { %s1595_s21 = smov 0   ;;  %s1597_s22 = smov 0  }
   0xc LB: > { %1926 = sst [smem:[#allocation11_spill]] %s1524_s15  ;;  %s987_s23 = sadd.s32 4294967295, %s1552_s22   ;;  %s1552_s22 = sphi %s1597_s22, %s22_s22   ;;  %s1548_s21 = sphi %s1595_s21, %s1953_s21   ;;  %s1544_s20 = sphi %s1593_s20, %s1948_s20   ;;  %s1540_s19 = sphi %s1591_s19, %s1952_s19   ;;  %s1536_s18 = sphi %s1589_s18, %s1947_s18   ;;  %s1532_s17 = sphi %s1587_s17, %s1951_s17   ;;  %s1528_s16 = sphi %s1585_s16, %s1950_s16   ;;  %s1524_s15 = sphi %s1583_s15, %s1949_s15  }
   0xd   : > { %1927 = sst [smem:[#allocation12_spill]] %s1544_s20  ;;  %s988_s24 = sadd.s32 4294967294, %s1552_s22  }
   0xe   : > { %1928 = sst [smem:[#allocation13_spill]] %s1552_s22  ;;  %p50_p0 = scmp.ne.s32.totalorder %s1532_s17, %s1528_s16 }
   0xf   : > { %p51_p1 = scmp.eq.s32.totalorder %s1552_s22, 0  ;;  %p56_p2 = scmp.ne.s32.totalorder %s1528_s16, %s1524_s15 }
  0x10   : > { %p1631_p3 = scmp.eq.s32.totalorder %s987_s23, 0  ;;  %p103_p4 = scmp.eq.s32.totalorder %s987_s23, 7 }
  0x11   : > { %p1635_p5 = por %p51_p1, %p50_p0  ;;  %p109_p6 = scmp.eq.s32.totalorder %s988_s24, 7 }
  0x12   : > { %p1641_p7 = por %p1631_p3, %p56_p2  ;;  %p1645_p8 = por %p103_p4, %p50_p0 }
  0x13   : > { %p1649_p9 = por %p109_p6, %p56_p2  ;;  %p989_p10 = scmp.ge.s32.totalorder %s1552_s22, 1 }
  0x14   : > { %s1932_s29 = scalar_select %p1645_p8, 1, 0 }
  0x15   : > { %s1934_s30 = scalar_select %p1649_p9, 1, 0 }
  0x16   : > { %1933 = sst [smem:[#allocation14_spill]] %s1932_s29  ;;  %p172_p11 = scmp.lt.s32.totalorder %s1552_s22, 9 }
  0x17   : > { %1935 = sst [smem:[#allocation15_spill]] %s1934_s30  ;;  %s1554_s9 = smov [#allocation5]  }
  0x18   : > { %s1936_s1 = sld [smem:[#allocation17_spill]]  ;;  %p1658_p12 = pnand %p989_p10, %p172_p11 }
  0x19   : > { %s186_s10 = sshll.u32 %s1554_s9, 4  ;;  %p1319_p0 = scmp.lt.s32.totalorder %s1552_s22, 8  ;;  %s187_s10 = int_to_ptr.vmem [resolvable:$true] %s186_s10 }
  0x1a   : > { %p1306_p13 = pneg %p1658_p12  ;;  %s31_s12 = sadd.s32 1, %s1544_s20 }
  0x1b   : > { %p1669_p2 = pnand %p1319_p0, %p1635_p5  ;;  %p32_p4 = scmp.ge.s32.totalorder %s31_s12, 4 }
  0x1c   : > { %p1307_p1 = pnand %p1306_p13, %p1631_p3  ;;  %s34_s13 = sadd.s32 1, %s1548_s21 }
  0x1d   : > { %s197_s14 = sand.u32 1, %s1532_s17   ;;  %s992_s23 = sshll.u32 %s1544_s20, 3 }
  0x1e   : > { %s184_s7 = sshll.u32 %s1936_s1, 4  ;;  %s1955_s12 = smov (%p32_p4, %s31_s12), 0  ;;  %s185_s7 = int_to_ptr.hbm [resolvable:$true] %s184_s7 }
  0x1f   : > { %1309 = dma.hbm_to_vmem [thread:$0]  (!%p1307_p1), %s185_s7, 64, %s187_s10, [#allocation6]  }
  0x20   : > { %1939 = sst [smem:[#allocation16_spill]] %s1955_s12  ;;  %s1957_s13 = smov (!%p32_p4, %s34_s13), %s1548_s21 }
  0x21   : > { %s39_s24 = ssub.s32 %s1544_s20, %s1955_s12  ;;  %p36_p6 = scmp.ge.s32.totalorder %s1957_s13, 2 }
  0x22   : > { %s1295_s27 = smul.u32 448, %s197_s14  ;;  %s1940_s20 = sadd.s32 1, %s1532_s17 }
  0x23   : > { %s1296_s5 = smul.u32 448, %s1548_s21  ;;  %s1959_s13 = smov (%p36_p6, %s1957_s13), 0 }
  0x24   : > { %s38_s7 = ssub.s32 %s1548_s21, %s1959_s13  ;;  %s201_s22 = scalar_lea.vmem [#allocation2], %s1295_s27 }
  0x25   : > { %s206_s6 = sadd.s32 %s1296_s5, %s992_s23  ;;  %s40_s10 = sor.u32 %s39_s24, %s38_s7 }
  0x26   : > { %s993_s9 = sshll.u32 %s206_s6, 2  ;;  %p41_p5 = scmp.eq.s32.totalorder %s40_s10, 0 }
  0x27   : > { %s208_s30 = scalar_lea.hbm %s1910_s0, %s993_s9  ;;  %s211_s12 = sshll.u32 %s201_s22, 4  ;;  %s212_s12 = int_to_ptr.vmem [resolvable:$true] %s211_s12 }
  0x28   : > { %s209_s15 = sshll.u32 %s208_s30, 4  ;;  %s198_s3 = scalar_lea.sflag [#allocation3], %s197_s14  ;;  %s210_s15 = int_to_ptr.hbm [resolvable:$true] %s209_s15 }
  0x29   : > { %s1693_s4 = scalar_select %p41_p5, %s1532_s17, %s1940_s20  }
  0x2a   : > { %s1555_s29 = smov 2048   ;;  %s1556_s23 = smov 512  }
  0x2b   : > { %s1557_s5 = smov 32   ;;  %223 = sbr.rel (%p1658_p12) target bundleno = 373 (0x175), region = 28 }
  0x2c   : > { %1313 = dma.hbm_to_vmem [thread:$0]  (!%p1669_p2), %s210_s15, 7168, %s212_s12, %s198_s3, %s1555_s29, %s1556_s23, %s1557_s5  }
  0x2d   : > { %s1700_s1 = sand.u32 (!%p1658_p12), 1, %s1528_s16  }
  0x2e   : > { %s1297_s22 = smul.u32 (!%p1658_p12), 448, %s1700_s1  ;;  %s226_s25 = scalar_lea.sflag (!%p1658_p12), [#allocation3], %s1700_s1 }
  0x30   : > { %s1704_s20 = scalar_lea.vmem [#allocation2], %s1297_s22 }
  0x31   : > { %1511 = dma.done.wait (%p1641_p7), %s226_s25, 7168  }
  0x32   : > { %1513 = vsyncadd (%p1641_p7), %s226_s25, 4294960128 }
  0x33   : > { %1515 = dma.done.wait (%p1631_p3), [#allocation6], 64  }
  0x34   : > { %1517 = vsyncadd (%p1631_p3), [#allocation6], 4294967232  ;;  %v1195_v0 = vld [vmem:[%s1704_s20 + $0x180] sm:$0xf]  ;;  %v1287_v2 = vld [vmem:[%s1704_s20 + $0x184] sm:$0xf] }
  0x35   : > { %v1291_v1 = vld [vmem:[%s1704_s20 + $0x19c] sm:$0xf0]  ;;  %v1197_v4 = vld [vmem:[%s1704_s20 + $0x1a0] sm:$0xf0]  ;;  %v1203_v5 = vld [vmem:[%s1704_s20 + $0x188] sm:$0xf] }
  0x36   : > { %v1196_v3 = vor.u32 %v1291_v1, %v1195_v0  ;;  %v1292_v6 = vld [vmem:[%s1704_s20 + $0x1a4] sm:$0xf0]  ;;  %v1200_v7 = vor.u32 %v1287_v2, %v1197_v4  ;;  %v1288_v9 = vld [vmem:[%s1704_s20 + $0x18c] sm:$0xf]  ;;  %v1163_v11 = vld [vmem:[%s1704_s20 + $0x140] sm:$0xf] }
  0x37   : > { %v1204_v8 = vor.u32 %v1292_v6, %v1203_v5  ;;  %v1205_v10 = vld [vmem:[%s1704_s20 + $0x1a8] sm:$0xf0]  ;;  %v1283_v13 = vld [vmem:[%s1704_s20 + $0x15c] sm:$0xf0]  ;;  %v1279_v14 = vld [vmem:[%s1704_s20 + $0x144] sm:$0xf] }
  0x38   : > { %637 = vmatpush.bf16.msra.mxu0 %v1196_v3  ;;  %v1208_v12 = vor.u32 %v1288_v9, %v1205_v10  ;;  %v1165_v15 = vld [vmem:[%s1704_s20 + $0x160] sm:$0xf0]  ;;  %650 = vmatpush.bf16.msra.mxu1 %v1200_v7  ;;  %v1164_v16 = vor.u32 %v1283_v13, %v1163_v11  ;;  %v1171_v18 = vld [vmem:[%s1704_s20 + $0x148] sm:$0xf]  ;;  %v1280_v20 = vld [vmem:[%s1704_s20 + $0x14c] sm:$0xf] }
  0x39   : > { %663 = vmatpush.bf16.msra.mxu2 %v1204_v8  ;;  %v1168_v17 = vor.u32 %v1279_v14, %v1165_v15  ;;  %v1284_v19 = vld [vmem:[%s1704_s20 + $0x164] sm:$0xf0]  ;;  %v1173_v22 = vld [vmem:[%s1704_s20 + $0x168] sm:$0xf0]  ;;  %v1131_v23 = vld [vmem:[%s1704_s20 + $0x100] sm:$0xf] }
  0x3a   : > { %676 = vmatpush.bf16.msra.mxu3 %v1208_v12  ;;  %v1172_v21 = vor.u32 %v1284_v19, %v1171_v18  ;;  %v1275_v24 = vld [vmem:[%s1704_s20 + $0x11c] sm:$0xf0]  ;;  %v1176_v25 = vor.u32 %v1280_v20, %v1173_v22  ;;  %v1271_v26 = vld [vmem:[%s1704_s20 + $0x104] sm:$0xf]  ;;  %v1139_v28 = vld [vmem:[%s1704_s20 + $0x108] sm:$0xf] }
  0x3b   : > { %v1133_v27 = vld [vmem:[%s1704_s20 + $0x120] sm:$0xf0]  ;;  %v1132_v29 = vor.u32 %v1275_v24, %v1131_v23  ;;  %v1276_v30 = vld [vmem:[%s1704_s20 + $0x124] sm:$0xf0]  ;;  %v1272_v31 = vld [vmem:[%s1704_s20 + $0x10c] sm:$0xf] }
  0x3c   : > { %638 = vmatpush.bf16.msra.mxu0 %v1164_v16  ;;  %v1141_v32 = vld [vmem:[%s1704_s20 + $0x128] sm:$0xf0]  ;;  %651 = vmatpush.bf16.msra.mxu1 %v1168_v17  ;;  %v1136_v33 = vor.u32 %v1271_v26, %v1133_v27  ;;  %v1140_v34 = vor.u32 %v1276_v30, %v1139_v28  ;;  %v1099_v35 = vld [vmem:[%s1704_s20 + $0xc0] sm:$0xf]  ;;  %v1263_v37 = vld [vmem:[%s1704_s20 + $0xc4] sm:$0xf] }
  0x3d   : > { %664 = vmatpush.bf16.msra.mxu2 %v1172_v21  ;;  %v1267_v36 = vld [vmem:[%s1704_s20 + $0xdc] sm:$0xf0]  ;;  %v1144_v38 = vor.u32 %v1272_v31, %v1141_v32  ;;  %v1101_v39 = vld [vmem:[%s1704_s20 + $0xe0] sm:$0xf0]  ;;  %v1107_v40 = vld [vmem:[%s1704_s20 + $0xc8] sm:$0xf] }
  0x3e   : > { %677 = vmatpush.bf16.msra.mxu3 %v1176_v25  ;;  %v1268_v41 = vld [vmem:[%s1704_s20 + $0xe4] sm:$0xf0]  ;;  %v1264_v42 = vld [vmem:[%s1704_s20 + $0xcc] sm:$0xf]  ;;  %v1100_v44 = vor.u32 %v1267_v36, %v1099_v35  ;;  %v1104_v45 = vor.u32 %v1263_v37, %v1101_v39  ;;  %v1067_v47 = vld [vmem:[%s1704_s20 + $0x80] sm:$0xf] }
  0x3f   : > { %v1109_v43 = vld [vmem:[%s1704_s20 + $0xe8] sm:$0xf0]  ;;  %v1108_v46 = vor.u32 %v1268_v41, %v1107_v40  ;;  %v1259_v48 = vld [vmem:[%s1704_s20 + $0x9c] sm:$0xf0]  ;;  %v1255_v49 = vld [vmem:[%s1704_s20 + $0x84] sm:$0xf] }
  0x40   : > { %639 = vmatpush.bf16.msra.mxu0 %v1132_v29  ;;  %652 = vmatpush.bf16.msra.mxu1 %v1136_v33  ;;  %v1112_v50 = vor.u32 %v1264_v42, %v1109_v43  ;;  %v1069_v51 = vld [vmem:[%s1704_s20 + $0xa0] sm:$0xf0]  ;;  %v1075_v52 = vld [vmem:[%s1704_s20 + $0x88] sm:$0xf]  ;;  %v1256_v54 = vld [vmem:[%s1704_s20 + $0x8c] sm:$0xf]  ;;  %v1068_v56 = vor.u32 %v1259_v48, %v1067_v47 }
  0x41   : > { %665 = vmatpush.bf16.msra.mxu2 %v1140_v34  ;;  %v1260_v53 = vld [vmem:[%s1704_s20 + $0xa4] sm:$0xf0]  ;;  %v1077_v55 = vld [vmem:[%s1704_s20 + $0xa8] sm:$0xf0]  ;;  %v1072_v57 = vor.u32 %v1255_v49, %v1069_v51  ;;  %v1035_v59 = vld [vmem:[%s1704_s20 + $0x40] sm:$0xf] }
  0x42   : > { %678 = vmatpush.bf16.msra.mxu3 %v1144_v38  ;;  %v1076_v58 = vor.u32 %v1260_v53, %v1075_v52  ;;  %v1251_v60 = vld [vmem:[%s1704_s20 + $0x5c] sm:$0xf0]  ;;  %v1247_v61 = vld [vmem:[%s1704_s20 + $0x44] sm:$0xf]  ;;  %v1080_v62 = vor.u32 %v1256_v54, %v1077_v55  ;;  %v1043_v0 = vld [vmem:[%s1704_s20 + $0x48] sm:$0xf] }
  0x43   : > { %v1037_v63 = vld [vmem:[%s1704_s20 + $0x60] sm:$0xf0]  ;;  %v1252_v1 = vld [vmem:[%s1704_s20 + $0x64] sm:$0xf0]  ;;  %v1248_v2 = vld [vmem:[%s1704_s20 + $0x4c] sm:$0xf]  ;;  %v1036_v4 = vor.u32 %v1251_v60, %v1035_v59 }
  0x44   : > { %640 = vmatpush.bf16.msra.mxu0 %v1100_v44  ;;  %653 = vmatpush.bf16.msra.mxu1 %v1104_v45  ;;  %v1045_v3 = vld [vmem:[%s1704_s20 + $0x68] sm:$0xf0]  ;;  %v1003_v5 = vld [vmem:[%s1704_s20] sm:$0xf]  ;;  %v1040_v7 = vor.u32 %v1247_v61, %v1037_v63  ;;  %v1044_v8 = vor.u32 %v1252_v1, %v1043_v0  ;;  %v1239_v9 = vld [vmem:[%s1704_s20 + $0x4] sm:$0xf] }
  0x45   : > { %666 = vmatpush.bf16.msra.mxu2 %v1108_v46  ;;  %v1243_v6 = vld [vmem:[%s1704_s20 + $0x1c] sm:$0xf0]  ;;  %v1005_v10 = vld [vmem:[%s1704_s20 + $0x20] sm:$0xf0]  ;;  %v1011_v11 = vld [vmem:[%s1704_s20 + $0x8] sm:$0xf]  ;;  %v1048_v12 = vor.u32 %v1248_v2, %v1045_v3 }
  0x46   : > { %679 = vmatpush.bf16.msra.mxu3 %v1112_v50  ;;  %v1244_v13 = vld [vmem:[%s1704_s20 + $0x24] sm:$0xf0]  ;;  %v1240_v14 = vld [vmem:[%s1704_s20 + $0xc] sm:$0xf]  ;;  %v1211_v16 = vld [vmem:[%s1704_s20 + $0x190] sm:$0xf]  ;;  %v1004_v19 = vor.u32 %v1243_v6, %v1003_v5  ;;  %v1008_v23 = vor.u32 %v1239_v9, %v1005_v10 }
  0x47   : > { %v1013_v15 = vld [vmem:[%s1704_s20 + $0x28] sm:$0xf0]  ;;  %v1293_v17 = vld [vmem:[%s1704_s20 + $0x1ac] sm:$0xf0]  ;;  %v1289_v18 = vld [vmem:[%s1704_s20 + $0x194] sm:$0xf]  ;;  %v1012_v24 = vor.u32 %v1244_v13, %v1011_v11 }
  0x48   : > { %641 = vmatpush.bf16.msra.mxu0 %v1068_v56  ;;  %654 = vmatpush.bf16.msra.mxu1 %v1072_v57  ;;  %v1213_v20 = vld [vmem:[%s1704_s20 + $0x1b0] sm:$0xf0]  ;;  %v1219_v21 = vld [vmem:[%s1704_s20 + $0x198] sm:$0xf]  ;;  %v1290_v25 = vld [vmem:[%s1704_s20 + $0x19c] sm:$0xf]  ;;  %v1016_v27 = vor.u32 %v1240_v14, %v1013_v15  ;;  %v1212_v28 = vor.u32 %v1293_v17, %v1211_v16 }
  0x49   : > { %667 = vmatpush.bf16.msra.mxu2 %v1076_v58  ;;  %v1294_v22 = vld [vmem:[%s1704_s20 + $0x1b4] sm:$0xf0]  ;;  %v1221_v26 = vld [vmem:[%s1704_s20 + $0x1b8] sm:$0xf0]  ;;  %vm632_vm0 = vcmask 916480   ;;  %v1216_v29 = vor.u32 %v1289_v18, %v1213_v20  ;;  %s996_s3 = sshll.u32 %s1700_s1, 6 }
  0x4a   : > { %680 = vmatpush.bf16.msra.mxu3 %v1080_v62  ;;  %v1220_v30 = vor.u32 %v1294_v22, %v1219_v21  ;;  %v1179_v31 = vld [vmem:[%s1704_s20 + $0x150] sm:$0xf]  ;;  %v1281_v33 = vld [vmem:[%s1704_s20 + $0x154] sm:$0xf]  ;;  %v1224_v34 = vor.u32 %v1290_v25, %v1221_v26  ;;  %v1187_v36 = vld [vmem:[%s1704_s20 + $0x158] sm:$0xf] }
  0x4b   : > { %v1285_v32 = vld [vmem:[%s1704_s20 + $0x16c] sm:$0xf0]  ;;  %v1181_v35 = vld [vmem:[%s1704_s20 + $0x170] sm:$0xf0]  ;;  %v1286_v37 = vld [vmem:[%s1704_s20 + $0x174] sm:$0xf0] }
  0x4c   : > { %642 = vmatpush.bf16.msra.mxu0 %v1036_v4  ;;  %655 = vmatpush.bf16.msra.mxu1 %v1040_v7  ;;  %v1784_v38 = vld [vmem:[#allocation5] sm:$0xf]  ;;  %v1282_v39 = vld [vmem:[%s1704_s20 + $0x15c] sm:$0xf]  ;;  %v1180_v41 = vor.u32 %v1285_v32, %v1179_v31  ;;  %v1184_v42 = vor.u32 %v1281_v33, %v1181_v35  ;;  %v1188_v43 = vor.u32 %v1286_v37, %v1187_v36  ;;  %v1147_v44 = vld [vmem:[%s1704_s20 + $0x110] sm:$0xf] }
  0x4d   : > { %668 = vmatpush.bf16.msra.mxu2 %v1044_v8  ;;  %v1189_v40 = vld [vmem:[%s1704_s20 + $0x178] sm:$0xf0]  ;;  %v1277_v45 = vld [vmem:[%s1704_s20 + $0x12c] sm:$0xf0]  ;;  %v1273_v46 = vld [vmem:[%s1704_s20 + $0x114] sm:$0xf] }
  0x4e   : > { %681 = vmatpush.bf16.msra.mxu3 %v1048_v12  ;;  %v1192_v47 = vor.u32 %v1282_v39, %v1189_v40  ;;  %v1149_v48 = vld [vmem:[%s1704_s20 + $0x130] sm:$0xf0]  ;;  %v1155_v49 = vld [vmem:[%s1704_s20 + $0x118] sm:$0xf]  ;;  %v1274_v51 = vld [vmem:[%s1704_s20 + $0x11c] sm:$0xf]  ;;  %v1148_v53 = vor.u32 %v1277_v45, %v1147_v44 }
  0x4f   : > { %v1278_v50 = vld [vmem:[%s1704_s20 + $0x134] sm:$0xf0]  ;;  %v1157_v52 = vld [vmem:[%s1704_s20 + $0x138] sm:$0xf0]  ;;  %v1152_v54 = vor.u32 %v1273_v46, %v1149_v48  ;;  %v1115_v56 = vld [vmem:[%s1704_s20 + $0xd0] sm:$0xf] }
  0x50   : > { %643 = vmatpush.bf16.msra.mxu0 %v1004_v19  ;;  %656 = vmatpush.bf16.msra.mxu1 %v1008_v23  ;;  %v1156_v55 = vor.u32 %v1278_v50, %v1155_v49  ;;  %v1269_v57 = vld [vmem:[%s1704_s20 + $0xec] sm:$0xf0]  ;;  %v1265_v58 = vld [vmem:[%s1704_s20 + $0xd4] sm:$0xf]  ;;  %v1160_v59 = vor.u32 %v1274_v51, %v1157_v52  ;;  %v1123_v61 = vld [vmem:[%s1704_s20 + $0xd8] sm:$0xf] }
  0x51   : > { %669 = vmatpush.bf16.msra.mxu2 %v1012_v24  ;;  %v1117_v60 = vld [vmem:[%s1704_s20 + $0xf0] sm:$0xf0]  ;;  %v1270_v62 = vld [vmem:[%s1704_s20 + $0xf4] sm:$0xf0]  ;;  %v1266_v63 = vld [vmem:[%s1704_s20 + $0xdc] sm:$0xf]  ;;  %v1116_v1 = vor.u32 %v1269_v57, %v1115_v56 }
  0x52   : > { %682 = vmatpush.bf16.msra.mxu3 %v1016_v27  ;;  %v1125_v0 = vld [vmem:[%s1704_s20 + $0xf8] sm:$0xf0]  ;;  %v1120_v2 = vor.u32 %v1265_v58, %v1117_v60  ;;  %v1124_v3 = vor.u32 %v1270_v62, %v1123_v61  ;;  %v1083_v4 = vld [vmem:[%s1704_s20 + $0x90] sm:$0xf]  ;;  %v1257_v6 = vld [vmem:[%s1704_s20 + $0x94] sm:$0xf] }
  0x53   : > { %1225 = vmatmul.msk.bf16.vlgmr.msra.gmra.mxu0 %vm632_vm0, %v1784_v38  ;;  %1226 = vmatmul.msk.bf16.vlgmr.msra.gmra.mxu1 %vm632_vm0, %v1784_v38  ;;  %v1261_v5 = vld [vmem:[%s1704_s20 + $0xac] sm:$0xf0]  ;;  %v1128_v7 = vor.u32 %v1266_v63, %v1125_v0  ;;  %v1085_v8 = vld [vmem:[%s1704_s20 + $0xb0] sm:$0xf0]  ;;  %v1091_v9 = vld [vmem:[%s1704_s20 + $0x98] sm:$0xf] }
  0x54   : > { %689 = vmatpush.bf16.msrb.mxu0 %v1212_v28  ;;  %702 = vmatpush.bf16.msrb.mxu1 %v1216_v29  ;;  %v1262_v10 = vld [vmem:[%s1704_s20 + $0xb4] sm:$0xf0]  ;;  %v1258_v11 = vld [vmem:[%s1704_s20 + $0x9c] sm:$0xf]  ;;  %v1084_v13 = vor.u32 %v1261_v5, %v1083_v4  ;;  %v1088_v14 = vor.u32 %v1257_v6, %v1085_v8  ;;  %v1051_v16 = vld [vmem:[%s1704_s20 + $0x50] sm:$0xf] }
  0x55   : > { %715 = vmatpush.bf16.msrb.mxu2 %v1220_v30  ;;  %1228 = vmatmul.msk.bf16.vlgmr.msra.gmra.mxu3 %vm632_vm0, %v1784_v38  ;;  %v1093_v12 = vld [vmem:[%s1704_s20 + $0xb8] sm:$0xf0]  ;;  %v1092_v15 = vor.u32 %v1262_v10, %v1091_v9  ;;  %v1253_v17 = vld [vmem:[%s1704_s20 + $0x6c] sm:$0xf0]  ;;  %v1249_v18 = vld [vmem:[%s1704_s20 + $0x54] sm:$0xf] }
  0x56   : > { %728 = vmatpush.bf16.msrb.mxu3 %v1224_v34  ;;  %1227 = vmatmul.msk.bf16.vlgmr.msra.gmra.mxu2 %vm632_vm0, %v1784_v38  ;;  %v1096_v19 = vor.u32 %v1258_v11, %v1093_v12  ;;  %v1053_v20 = vld [vmem:[%s1704_s20 + $0x70] sm:$0xf0]  ;;  %v1059_v21 = vld [vmem:[%s1704_s20 + $0x58] sm:$0xf]  ;;  %v1250_v23 = vld [vmem:[%s1704_s20 + $0x5c] sm:$0xf]  ;;  %v1052_v25 = vor.u32 %v1253_v17, %v1051_v16 }
  0x57   : > { %v1254_v22 = vld [vmem:[%s1704_s20 + $0x74] sm:$0xf0]  ;;  %v1061_v24 = vld [vmem:[%s1704_s20 + $0x78] sm:$0xf0]  ;;  %v1056_v26 = vor.u32 %v1249_v18, %v1053_v20  ;;  %v1019_v28 = vld [vmem:[%s1704_s20 + $0x10] sm:$0xf] }
  0x58   : > { %690 = vmatpush.bf16.msrb.mxu0 %v1180_v41  ;;  %703 = vmatpush.bf16.msrb.mxu1 %v1184_v42  ;;  %v1060_v27 = vor.u32 %v1254_v22, %v1059_v21  ;;  %v1245_v29 = vld [vmem:[%s1704_s20 + $0x2c] sm:$0xf0]  ;;  %v1241_v30 = vld [vmem:[%s1704_s20 + $0x14] sm:$0xf]  ;;  %v1064_v31 = vor.u32 %v1250_v23, %v1061_v24  ;;  %v1027_v33 = vld [vmem:[%s1704_s20 + $0x18] sm:$0xf] }
  0x59   : > { %716 = vmatpush.bf16.msrb.mxu2 %v1188_v43  ;;  %v1021_v32 = vld [vmem:[%s1704_s20 + $0x30] sm:$0xf0]  ;;  %v1246_v34 = vld [vmem:[%s1704_s20 + $0x34] sm:$0xf0]  ;;  %v1242_v35 = vld [vmem:[%s1704_s20 + $0x1c] sm:$0xf]  ;;  %v1020_v37 = vor.u32 %v1245_v29, %v1019_v28 }
  0x5a   : > { %729 = vmatpush.bf16.msrb.mxu3 %v1192_v47  ;;  %v1029_v36 = vld [vmem:[%s1704_s20 + $0x38] sm:$0xf0]  ;;  %v1024_v39 = vor.u32 %v1241_v30, %v1021_v32  ;;  %v1028_v40 = vor.u32 %v1246_v34, %v1027_v33  ;;  %s1845_s15 = scalar_lea.vmem [#allocation7], %s996_s3  ;;  %s1234_s26 = sshll.u32 %s1536_s18, 3 }
  0x5b   : > { %v1032_v41 = vor.u32 %v1242_v35, %v1029_v36  ;;  %s1235_s28 = sshll.u32 %s1540_s19, 5  ;;  %s809_s14 = sshll.u32 %s1845_s15, 4  ;;  %s810_s14 = int_to_ptr.vmem [resolvable:$true] %s809_s14 }
  0x5c   : > { %691 = vmatpush.bf16.msrb.mxu0 %v1148_v53  ;;  %704 = vmatpush.bf16.msrb.mxu1 %v1152_v54  ;;  %s805_s29 = sadd.s32 %s1235_s28, %s1234_s26  ;;  %s778_s6 = scalar_lea.sflag [#allocation4], %s1700_s1 }
  0x5d   : > { %717 = vmatpush.bf16.msrb.mxu2 %v1156_v55  ;;  %s1236_s30 = sshll.u32 %s805_s29, 3  ;;  %s1470_s5 = scalar_lea.hbm %s1912_s2, 512 }
  0x5e   : > { %730 = vmatpush.bf16.msrb.mxu3 %v1160_v59  ;;  %s807_s12 = scalar_lea.hbm %s1912_s2, %s1236_s30 }
  0x5f   : > { %s811_s24 = sshll.u32 %s807_s12, 4  ;;  %s812_s24 = int_to_ptr.hbm [resolvable:$true] %s811_s24 }
  0x60   : > { %692 = vmatpush.bf16.msrb.mxu0 %v1116_v1  ;;  %705 = vmatpush.bf16.msrb.mxu1 %v1120_v2  ;;  %s1464_s7 = sshra.s32 %s812_s24, 4  ;;  %s1465_s7 = int_to_ptr.hbm [resolvable:$true] %s1464_s7 }
  0x61   : > { %718 = vmatpush.bf16.msrb.mxu2 %v1124_v3  ;;  %s1466_s9 = scalar_lea.hbm %s1465_s7, 64  ;;  %p1471_p11 = scmp.lt.s32.totalorder %s1465_s7, %s1912_s2 }
  0x62   : > { %731 = vmatpush.bf16.msrb.mxu3 %v1128_v7  ;;  %p1467_p3 = scmp.ne.s32.totalorder %s1465_s7, %s1466_s9  ;;  %p1472_p12 = scmp.lt.s32.totalorder %s1470_s5, %s1466_s9 }
  0x64   : > { %693 = vmatpush.bf16.msrb.mxu0 %v1084_v13  ;;  %706 = vmatpush.bf16.msrb.mxu1 %v1088_v14  ;;  %p1468_p7 = pnand %p1467_p3, %p1645_p8  ;;  %p1473_p13 = por %p1472_p12, %p1471_p11 }
  0x65   : > { %719 = vmatpush.bf16.msrb.mxu2 %v1092_v15 }
  0x66   : > { %732 = vmatpush.bf16.msrb.mxu3 %v1096_v19  ;;  %p1469_p10 = pneg %p1468_p7 }
  0x68   : > { %694 = vmatpush.bf16.msrb.mxu0 %v1052_v25  ;;  %707 = vmatpush.bf16.msrb.mxu1 %v1056_v26  ;;  %p1474_p0 = pnand %p1473_p13, %p1469_p10 }
  0x69   : > { %720 = vmatpush.bf16.msrb.mxu2 %v1060_v27 }
  0x6a   : > { %733 = vmatpush.bf16.msrb.mxu3 %v1064_v31 }
  0x6c   : > { %695 = vmatpush.bf16.msrb.mxu0 %v1020_v37  ;;  %708 = vmatpush.bf16.msrb.mxu1 %v1024_v39 }
  0x6d   : > { %721 = vmatpush.bf16.msrb.mxu2 %v1028_v40 }
  0x6e   : > { %734 = vmatpush.bf16.msrb.mxu3 %v1032_v41 }
  0x6f   : > { %1229 = vmatmul.msk.bf16.vlgmr.msrb.gmra.mxu0 %vm632_vm0, %v1784_v38  ;;  %1230 = vmatmul.msk.bf16.vlgmr.msrb.gmra.mxu1 %vm632_vm0, %v1784_v38 }
  0x70   : > { %1231 = vmatmul.msk.bf16.vlgmr.msrb.gmra.mxu2 %vm632_vm0, %v1784_v38 }
  0x71   : > { %1232 = vmatmul.msk.bf16.vlgmr.msrb.gmra.mxu3 %vm632_vm0, %v1784_v38 }
  0xd0   : > { %v645_v42 = vpop.f32.mrf.mxu0  ;;  %v658_v43 = vpop.f32.mrf.mxu1 }
  0xd1   : > { %740 = vst [vmem:[%s1845_s15] sm:$0xff] %v645_v42  ;;  %v748_v49 = vadd.f32 %v658_v43, %v645_v42  ;;  %v759_v50 = vmul.f32 %v645_v42, %v645_v42  ;;  %v760_v51 = vmul.f32 %v658_v43, %v658_v43 }
  0xd2   : > { %741 = vst [vmem:[%s1845_s15 + $0x8] sm:$0xff] %v658_v43 }
  0xd3   : > { %v767_v53 = vadd.f32 %v760_v51, %v759_v50 }
  0xd8   : > { %v684_v45 = vpop.f32.mrf.mxu3  ;;  %v647_v46 = vpop.f32.mrf.mxu0 }
  0xd9   : > { %v671_v44 = vpop.f32.mrf.mxu2  ;;  %743 = vst [vmem:[%s1845_s15 + $0x18] sm:$0xff] %v684_v45  ;;  %v660_v47 = vpop.f32.mrf.mxu1  ;;  %v762_v59 = vmul.f32 %v684_v45, %v684_v45 }
  0xda   : > { %742 = vst [vmem:[%s1845_s15 + $0x10] sm:$0xff] %v671_v44  ;;  %v749_v52 = vadd.f32 %v748_v49, %v671_v44  ;;  %v761_v54 = vmul.f32 %v671_v44, %v671_v44 }
  0xdc   : > { %v750_v55 = vadd.f32 %v749_v52, %v684_v45  ;;  %v768_v58 = vadd.f32 %v767_v53, %v761_v54 }
  0xde   : > { %v769_v62 = vadd.f32 %v768_v58, %v762_v59 }
  0xe0   : > { %v686_v48 = vpop.f32.mrf.mxu3 }
  0xe1   : > { %v673_v38 = vpop.f32.mrf.mxu2 }
  0xec   : > { %v697_v56 = vpop.f32.mrf.mxu0  ;;  %v710_v57 = vpop.f32.mrf.mxu1 }
  0xed   : > { %744 = vst [vmem:[%s1845_s15 + $0x20] sm:$0xff] %v697_v56  ;;  %v751_v60 = vadd.f32 %v750_v55, %v697_v56  ;;  %v763_v61 = vmul.f32 %v697_v56, %v697_v56  ;;  %v764_v2 = vmul.f32 %v710_v57, %v710_v57 }
  0xee   : > { %745 = vst [vmem:[%s1845_s15 + $0x28] sm:$0xff] %v710_v57 }
  0xef   : > { %v752_v63 = vadd.f32 %v751_v60, %v710_v57  ;;  %v770_v1 = vadd.f32 %v769_v62, %v763_v61 }
  0xf3   : > { %v723_v0 = vpop.f32.mrf.mxu2 }
  0xf4   : > { %746 = vst [vmem:[%s1845_s15 + $0x30] sm:$0xff] %v723_v0  ;;  %v736_v3 = vpop.f32.mrf.mxu3  ;;  %v699_v4 = vpop.f32.mrf.mxu0  ;;  %v753_v5 = vadd.f32 %v752_v63, %v723_v0  ;;  %v765_v7 = vmul.f32 %v723_v0, %v723_v0 }
  0xf5   : > { %747 = vst [vmem:[%s1845_s15 + $0x38] sm:$0xff] %v736_v3  ;;  %v712_v6 = vpop.f32.mrf.mxu1 }
  0xf6   : > { %v754_v8 = vadd.f32 %v753_v5, %v736_v3 }
  0xf7   : > { %1477 = shalt.err (!%p1474_p0)
}
  0xf8   : > { %1304 = dma.vmem_to_hbm [thread:$0]  (%p1645_p8), %s810_s14, 1024, %s812_s24, %s778_s6   ;;  %755 = vadd.xlane.f32.xlu0 %v754_v8  ;;  %v771_v9 = vadd.f32 %v770_v1, %v764_v2  ;;  %v766_v10 = vmul.f32 %v736_v3, %v736_v3  ;;  %vm757_vm1 = vcmask 7168  }
  0xf9   : > { %p278_p1 = scmp.lt.s32.totalorder %s1540_s19, 1  ;;  %p280_p2 = scmp.lt.s32.totalorder %s1536_s18, 3 }
  0xfa   : > { %v772_v11 = vadd.f32 %v771_v9, %v765_v7  ;;  %s1942_s28 = sld [smem:[#allocation18_spill]] }
  0xfb   : > { %v725_v12 = vpop.f32.mrf.mxu2  ;;  %s1961_s19 = smov (!%p278_p1, %s1540_s19), 1  ;;  %s1963_s18 = smov (!%p280_p2, %s1536_s18), 3 }
  0xfc   : > { %v738_v13 = vpop.f32.mrf.mxu3  ;;  %v773_v14 = vadd.f32 %v772_v11, %v766_v10  ;;  %s997_s1 = sshll.u32 %s1961_s19, 2  ;;  %s1943_s11 = sld [smem:[#allocation19_spill]] }
  0xfd   : > { %s283_s20 = sadd.s32 %s997_s1, %s1963_s18 }
  0xfe   : > { %s998_s3 = sshll.u32 %s283_s20, 3 }
 0x100   : > { %774 = vadd.xlane.f32.xlu0 %v773_v14  ;;  %s285_s29 = scalar_lea.vmem %s1942_s28, %s998_s3 }
 0x102   : > { %s293_s12 = scalar_lea.vmem %s1943_s11, %s998_s3 }
 0x16b   : > { %v756_v15 = vpop.xlane.xlu0 %755 }
 0x16c   : > { %758 = vst.msk [vmem:[%s285_s29] sm:$0xff] %vm757_vm1, %v756_v15 }
 0x173   : > { %v775_v16 = vpop.xlane.xlu0 %774 }
 0x174   : > { %776 = vst.msk [vmem:[%s293_s12] sm:$0xff] %vm757_vm1, %v775_v16 }
 0x175 PF: > { %s1944_s14 = sld [smem:[#allocation13_spill]] }
 0x176   : > { %s1945_s24 = sld [smem:[#allocation11_spill]] }
 0x17b   : > { %p1321_p8 = scmp.ge.s32.totalorder %s1944_s14, 2 }
 0x17c   : > { %s829_s18 = sand.u32 1, %s1945_s24  }
 0x17d   : > { %p1315_p4 = pnand %p1321_p8, %p1649_p9  ;;  %s830_s19 = scalar_lea.sflag [#allocation4], %s829_s18 }
 0x17f   : > { %p1316_p6 = pneg %p1315_p4 }
 0x181   : > { %1519 = dma.done.wait (%p1316_p6), %s830_s19, 1024  }
 0x182   : > { %1521 = vsyncadd (%p1316_p6), %s830_s19, 4294966272  ;;  %s22_s22 = sadd.s32 1, %s1944_s14   ;;  %s1947_s18 = sld [smem:[#allocation12_spill]] }
 0x183   : > { %p19_p5 = scmp.ge.s32.totalorder %s22_s22, 10   ;;  %s1948_s20 = sld [smem:[#allocation16_spill]] }
 0x184   : > { %s1949_s15 = smov %s1528_s16  ;;  %s1950_s16 = smov %s1532_s17 }
 0x185   : > { %s1951_s17 = smov %s1693_s4  ;;  %s1952_s19 = smov %s1548_s21 }
 0x186   : > { %s1953_s21 = smov %s1959_s13  ;;  %21 = sbr.rel (!%p19_p5) target bundleno = 12 (0xc), region = 101 }
 0x18b   :  { %858 = vsyncpa [#allocation3], 1 }
 0x18c   :  { %860 = vsyncpa [#allocation3 + $0x1], 1 }
 0x18d   :  { %861 = vsyncpa [#allocation6], 1 }
 0x18e   :  { %862 = vsyncpa [#allocation4], 1 }
 0x18f   :  { %864 = vsyncpa [#allocation4 + $0x1], 1 }

</bundles_post_ra>
